<compile_context>
chip_gen: v7x
topology: tpu7x:2x2x1
jax: 0.10.0
libtpu: 0.0.40
codegen_flags: <defaults>
</compile_context>

<pallas_src>
import jax
import jax.numpy as jnp
from jax import lax
from jax.experimental import pallas as pl
from jax.experimental.pallas import tpu as pltpu

_LANE = 128
_STRIP_ROWS = 512                  # 512 x 128 x 4B = 256 KiB f32 temp per strip
_DEFAULT_MAX_BLOCK_ROWS = 8192     # 8192 x 128 x 4B = 4 MiB f32 per grid step


def _round_up(x: int, m: int) -> int:
    return -(-x // m) * m


def _make_kernel(block_rows: int, strip_rows: int, rows: int, need_mask: bool):
    """Build the per-block partial kernel (all geometry is compile-time static)."""
    n_strips = block_rows // strip_rows

    def kernel(neg_ref, out_ref):
        i = pl.program_id(0)
        base_row = i * block_rows                     # scalar int32

        def strip_neg_log_sum(s, x):
            x = x.astype(jnp.float32)                 # in-kernel upcast (bf16 ok)
            if need_mask:
                # Rows past the true extent hold stale VMEM (Pallas boundary
                # padding); replace with 1.0 before the log so they add 0.
                row = (base_row + s * strip_rows
                       + lax.broadcasted_iota(jnp.int32, (strip_rows, _LANE), 0))
                x = jnp.where(row < rows, x, 1.0)
            return jnp.sum(jnp.log(x))

        if n_strips == 1:
            total = strip_neg_log_sum(0, neg_ref[...])
        else:
            def body(s, acc):
                start = pl.multiple_of(s * strip_rows, strip_rows)
                return acc + strip_neg_log_sum(s, neg_ref[pl.ds(start, strip_rows), :])
            total = lax.fori_loop(0, n_strips, body, jnp.zeros((), jnp.float32))

        # Lane-dense (1, 128) partial write; the wrapper reads lane 0.
        out_ref[...] = jnp.broadcast_to(-total, (1, _LANE))

    return kernel


def sgns_loss(positive: jax.Array, negatives: jax.Array,
              *, max_block_rows: int = _DEFAULT_MAX_BLOCK_ROWS) -> jax.Array:
    """positive: (B,), negatives: (B, K). Returns scalar f32 loss."""
    B, K = negatives.shape
    assert positive.shape == (B,)
    assert max_block_rows % _STRIP_ROWS == 0 and max_block_rows >= _STRIP_ROWS

    total_elems = B * K
    rows = pl.cdiv(total_elems, _LANE)

    # Lane-dense view of the negatives.  Zero-copy bitcast when B*K % 128 == 0;
    # otherwise pad only the <128-element tail with 1.0 (one extra HBM pass --
    # keep B*K 128-aligned for the fast path).
    flat = negatives.reshape(-1)
    if rows * _LANE != total_elems:
        pad = rows * _LANE - total_elems
        flat = jnp.concatenate([flat, jnp.ones((pad,), dtype=flat.dtype)])
    neg2d = flat.reshape(rows, _LANE)

    # Static block / strip geometry.
    if rows > max_block_rows:
        nb = max(2, pl.cdiv(rows, max_block_rows))
        nb += nb % 2                                   # even count -> balanced v7x TC split
        block_rows = min(_round_up(pl.cdiv(rows, nb), _STRIP_ROWS), max_block_rows)
        strip_rows = _STRIP_ROWS
    elif rows > 2 * _STRIP_ROWS:
        block_rows = _round_up(pl.cdiv(rows, 2), _STRIP_ROWS)   # 2 blocks -> both TCs
        strip_rows = _STRIP_ROWS
    else:
        block_rows = _round_up(rows, 8)                # single small block
        strip_rows = block_rows
    num_blocks = pl.cdiv(rows, block_rows)
    need_mask = (rows % block_rows) != 0               # only last block can overrun

    kernel = _make_kernel(block_rows, strip_rows, rows, need_mask)

    itemsize = jnp.dtype(negatives.dtype).itemsize
    cost = pl.CostEstimate(
        flops=rows * _LANE,
        transcendentals=rows * _LANE,
        bytes_accessed=rows * _LANE * itemsize + num_blocks * _LANE * 4,
    )

    partials = pl.pallas_call(
        kernel,
        out_shape=jax.ShapeDtypeStruct((num_blocks, _LANE), jnp.float32),
        grid=(num_blocks,),
        in_specs=[pl.BlockSpec((block_rows, _LANE), lambda i: (i, 0))],
        out_specs=pl.BlockSpec((1, _LANE), lambda i: (i, 0)),
        compiler_params=pltpu.CompilerParams(
            dimension_semantics=("parallel",),
            vmem_limit_bytes=32 * 1024 * 1024),
        cost_estimate=cost,
    )(neg2d)

    # Positives are (K+1)x smaller than negatives: one fused XLA op beats a
    # second DMA stream + resident buffer inside the kernel.
    pos_loss = -jnp.sum(jnp.log(positive.astype(jnp.float32)))

    return (pos_loss + jnp.sum(partials[:, 0])) / B


if __name__ == "__main__":
    key = jax.random.PRNGKey(0)

    def reference(positive, negatives):
        p = positive.astype(jnp.float32)
        n = negatives.astype(jnp.float32)
        return jnp.mean(-jnp.log(p) + jnp.sum(-jnp.log(n), axis=1))

    # (1) Small aligned shape (B*K == 128): zero-copy reshape, single block,
    #     last-block row mask active (1 valid row of an 8-row block).
    k1, k2 = jax.random.split(key)
    B, K = 8, 16
    pos = jax.nn.sigmoid(jax.random.normal(k1, (B,), dtype=jnp.float32))
    neg = jax.nn.sigmoid(jax.random.normal(k2, (B, K), dtype=jnp.float32))
    out = sgns_loss(pos, neg)
    jax.block_until_ready(out)
    ref = reference(pos, neg)
    assert jnp.allclose(out, ref, rtol=1e-4, atol=1e-4), (out, ref)

    # (2) Unaligned B*K -> exercises the <128-element tail pad (log(1) == 0).
    k3, k4 = jax.random.split(k2)
    B, K = 48, 20
    pos = jax.nn.sigmoid(jax.random.normal(k3, (B,), dtype=jnp.float32))
    neg = jax.nn.sigmoid(jax.random.normal(k4, (B, K), dtype=jnp.float32))
    out = sgns_loss(pos, neg)
    jax.block_until_ready(out)
    ref = reference(pos, neg)
    assert jnp.allclose(out, ref, rtol=1e-4, atol=1e-4), (out, ref)

    # (3) Multi-block parallel grid (small max_block_rows just to exercise the
    #     path) with bf16 ingestion + in-kernel upcast + last-block masking.
    k5, k6 = jax.random.split(k4)
    B, K = 512, 130   # rows = 520 > 512 -> 2 blocks
    pos = jax.nn.sigmoid(jax.random.normal(k5, (B,), dtype=jnp.float32)).astype(jnp.bfloat16)
    neg = jax.nn.sigmoid(jax.random.normal(k6, (B, K), dtype=jnp.float32)).astype(jnp.bfloat16)
    out = sgns_loss(pos, neg, max_block_rows=512)
    jax.block_until_ready(out)
    ref = reference(pos, neg)
    assert jnp.allclose(out, ref, rtol=1e-3, atol=1e-3), (out, ref)

    # (4) Default geometry, medium size: 2 blocks x 2 strips (fori_loop path),
    #     aligned (zero-copy), mask on the final strip.
    k7, k8 = jax.random.split(k6)
    B, K = 96, 1400   # rows = 1050 -> block_rows 1024, 2 blocks
    pos = jax.nn.sigmoid(jax.random.normal(k7, (B,), dtype=jnp.float32))
    neg = jax.nn.sigmoid(jax.random.normal(k8, (B, K), dtype=jnp.float32))
    out = sgns_loss(pos, neg)
    jax.block_until_ready(out)
    ref = reference(pos, neg)
    assert jnp.allclose(out, ref, rtol=1e-4, atol=1e-4), (out, ref)

    print("KERNEL_OK")
</pallas_src>

<mosaic_0001>
module attributes {stable_mosaic.version = 11 : i64} {
  func.func @kernel(%arg0: i32, %arg1: memref<8x128xf32, #tpu.memory_space<vmem>>, %arg2: memref<1x128xf32, #tpu.memory_space<vmem>>) attributes {dimension_semantics = [#tpu.dimension_semantics<parallel>], iteration_bounds = array<i64: 1>, scalar_prefetch = 0 : i64, scratch_operands = 0 : i64, tpu.core_type = #tpu.core_type<tc>, window_params = [{transform_indices = @transform_0, window_bounds = array<i64: 8, 128>}, {transform_indices = @transform_1, window_bounds = array<i64: 1, 128>}]} {
    %c8_i32 = arith.constant 8 : i32
    %0 = arith.muli %arg0, %c8_i32 : i32
    %c0 = arith.constant 0 : index
    %c0_0 = arith.constant 0 : index
    %1 = vector.load %arg1[%c0, %c0_0] : memref<8x128xf32, #tpu.memory_space<vmem>>, vector<8x128xf32>
    %c0_i32 = arith.constant 0 : i32
    %2 = arith.addi %0, %c0_i32 : i32
    %3 = tpu.iota {dimensions = array<i32: 0>} : vector<8x128xi32>
    %4 = vector.broadcast %2 : i32 to vector<8x128xi32>
    %5 = arith.addi %4, %3 : vector<8x128xi32>
    %c1_i32 = arith.constant 1 : i32
    %6 = vector.broadcast %c1_i32 : i32 to vector<8x128xi32>
    %7 = arith.cmpi slt, %5, %6 : vector<8x128xi32>
    %cst = arith.constant 1.000000e+00 : f32
    %8 = vector.broadcast %cst : f32 to vector<8x128xf32>
    %9 = arith.select %7, %1, %8 : vector<8x128xi1>, vector<8x128xf32>
    %10 = math.log %9 : vector<8x128xf32>
    %11 = vector.shape_cast %10 : vector<8x128xf32> to vector<1x8x128xf32>
    %cst_1 = arith.constant dense<0.000000e+00> : vector<1xf32>
    %12 = vector.multi_reduction <add>, %11, %cst_1 [1, 2] : vector<1x8x128xf32> to vector<1xf32>
    %13 = vector.shape_cast %12 : vector<1xf32> to vector<1x1x1xf32>
    %14 = vector.extract %13[0, 0, 0] : f32 from vector<1x1x1xf32>
    %cst_2 = arith.constant 0.000000e+00 : f32
    %15 = arith.subf %cst_2, %14 : f32
    %16 = vector.broadcast %15 : f32 to vector<1x128xf32>
    %c0_3 = arith.constant 0 : index
    %c0_4 = arith.constant 0 : index
    %17 = vector.load %arg2[%c0_3, %c0_4] : memref<1x128xf32, #tpu.memory_space<vmem>>, vector<1x128xf32>
    tpu.vector_store %arg2[%c0_3, %c0_4], %16 {strides = array<i32>} : memref<1x128xf32, #tpu.memory_space<vmem>>, vector<1x128xf32>,
    return
  }
  func.func @transform_0(%arg0: i32) -> (i32, i32) {
    %c0_i32 = arith.constant 0 : i32
    %c0_i32_0 = arith.constant 0 : i32
    return %arg0, %c0_i32 : i32, i32
  }
  func.func @transform_1(%arg0: i32) -> (i32, i32) {
    %c0_i32 = arith.constant 0 : i32
    %c0_i32_0 = arith.constant 0 : i32
    return %arg0, %c0_i32 : i32, i32
  }
}

</mosaic_0001>

<bundles_post_ra>
// kernel: tpu_custom_call.1
= control target key start
LH: loop header
LB: loop body
LE: loop exit
PB: predicated region body
PF: predicated region fallthrough
CT: control target
= control target key end

     0   :  { %6 = vsyncpa [#allocation3], 0  ;;  %s154_s0 = inlined_call_operand.hbm [shape: f32[1,128], index: 0, kind: input, shape index: {}]   ;;  %s155_s1 = inlined_call_operand.hbm [shape: f32[1,128], index: 1, kind: output, shape index: {}]  }
   0x1   :  { %7 = vsyncpa [#allocation4], 0 }
   0x2   :  { %12 = vsyncadd [#allocation3], 112  ;;  %s116_s6 = smov [#allocation2]   ;;  %s68_s10 = scalar_lea.hbm %s154_s0, 16 }
   0x3   :  { %s13_s7 = sshll.u32 %s116_s6, 4  ;;  %p69_p0 = scmp.ne.s32.totalorder %s154_s0, %s68_s10  ;;  %s14_s7 = int_to_ptr.vmem [resolvable:$true] %s13_s7 }
   0x4   :  { %p72_p1 = scmp.lt.u32.totalorder %s68_s10, %s154_s0 }
   0x6   :  { %p74_p2 = pnand %p72_p1, %p69_p0 }
   0x8   :  { %77 = shalt.err (!%p74_p2)
}
   0x9   :  { %s78_s15 = scalar_lea.vmem %s14_s7, 16  ;;  %s82_s16 = scalar_lea.vmem %s14_s7, 128 }
   0xa   :  { %p79_p3 = scmp.ne.s32.totalorder %s14_s7, %s78_s15  ;;  %p83_p4 = scmp.lt.s32.totalorder %s14_s7, %s14_s7 }
   0xb   :  { %p84_p5 = scmp.lt.s32.totalorder %s82_s16, %s78_s15 }
   0xd   :  { %p85_p6 = por %p84_p5, %p83_p4 }
   0xf   :  { %p86_p7 = pnand %p85_p6, %p79_p3 }
  0x11   :  { %89 = shalt.err (!%p86_p7)
}
  0x12   :  { %s117_s17 = smov 16   ;;  %s118_s18 = smov 1  }
  0x13   :  { %19 = dma.hbm_to_vmem [thread:$0]  %s154_s0, 16, %s14_s7, [#allocation3], %s117_s17, %s117_s17, %s118_s18  }
  0x14   :  { %112 = dma.done.wait [#allocation3], 128  }
  0x15   :  { %113 = vsyncadd [#allocation3], 4294967168  ;;  %v25_v0 = vlaneseq  ;;  %v24_v2 = vld [vmem:[#allocation2] sm:$0xff]  ;;  %s119_s0 = smov [#allocation5]  }
  0x16   :  { %s51_s21 = sshll.u32 %s119_s0, 4  ;;  %s52_s21 = int_to_ptr.vmem [resolvable:$true] %s51_s21 }
  0x17   :  { %v26_v1 = vshrl.u32 %v25_v0, 7  ;;  %s90_s24 = scalar_lea.vmem %s52_s21, 16  ;;  %s94_s25 = scalar_lea.vmem %s52_s21, 32 }
  0x18   :  { %p91_p8 = scmp.ne.s32.totalorder %s52_s21, %s90_s24  ;;  %p95_p9 = scmp.lt.s32.totalorder %s52_s21, %s52_s21 }
  0x19   :  { %vm29_vm0 = vcmp.lt.s32.totalorder %v26_v1, 1  ;;  %p96_p10 = scmp.lt.s32.totalorder %s94_s25, %s90_s24 }
  0x1a   :  { %v30_v3 = vsel %vm29_vm0, %v24_v2, 1.0 }
  0x1b   :  { %66 = vlog2.f32 %v30_v3  ;;  %p97_p11 = por %p96_p10, %p95_p9 }
  0x1d   :  { %p98_p12 = pnand %p97_p11, %p91_p8 }
  0x25   :  { %v67_v4 = vpop.eup %66 }
  0x26   :  { %v32_v5 = vmul.f32 0.6931472, %v67_v4 }
  0x28   :  { %33 = vadd.xlane.f32.xlu0 %v32_v5 }
  0xb5   :  { %v34_v6 = vpop.xlane.xlu0 %33 }
  0xb6   :  { %v35_v7 = vrot.slane %v34_v6, 4 }
  0xb8   :  { %v36_v8 = vadd.f32 %v35_v7, %v34_v6 }
  0xba   :  { %v37_v9 = vrot.slane %v36_v8, 2 }
  0xbc   :  { %v38_v10 = vadd.f32 %v37_v9, %v36_v8 }
  0xbe   :  { %v39_v11 = vrot.slane %v38_v10, 1 }
  0xc0   :  { %v40_v12 = vadd.f32 %v39_v11, %v38_v10 }
  0xc2   :  { %60 = vpush %v40_v12 }
  0xf3   :  { %s61_s22 = spop %60 }
  0xf4   :  { %s42_s23 = ssub.f32 0.0, %s61_s22 }
  0xf6   :  { %v43_v13 = vstv %s42_s23 }
  0xf7   :  { %44 = vst [vmem:[#allocation5] sm:$0x1] %v43_v13 }
  0xf8   :  { %101 = shalt.err (!%p98_p12)
}
  0xf9   :  { %s102_s28 = scalar_lea.hbm %s155_s1, 16 }
  0xfa   :  { %p103_p13 = scmp.ne.s32.totalorder %s155_s1, %s102_s28  ;;  %p106_p0 = scmp.lt.u32.totalorder %s102_s28, %s155_s1 }
  0xfc   :  { %p108_p1 = pnand %p106_p0, %p103_p13 }
  0xfe   :  { %111 = shalt.err (!%p108_p1)
}
  0xff   :  { %54 = dma.vmem_to_hbm [thread:$0]  %s52_s21, 16, %s155_s1, [#allocation4]  }
 0x100   :  { %114 = dma.done.wait [#allocation4], 16  }
 0x101   :  { %115 = vsyncadd [#allocation4], 4294967280 }
 0x102   :  { %58 = vsyncpa [#allocation3], 1 }
 0x103   :  { %59 = vsyncpa [#allocation4], 1 }

</bundles_post_ra>
